<compile_context>
chip_gen: v7x
topology: tpu7x:2x2x1
jax: 0.10.0
libtpu: 0.0.40
codegen_flags: <defaults>
</compile_context>

<pallas_src>
import math

import jax
import jax.numpy as jnp
from jax.experimental import pallas as pl
from jax.experimental.pallas import tpu as pltpu


def _drop_path_kernel(scale_ref, x_ref, o_ref):
    # scale_ref: (row_block, 1) f32 — 0.0 (dropped sample) or 1/keep_prob (kept sample).
    # x_ref / o_ref: (row_block, L) tiles; the multiply broadcasts the scale over lanes.
    s = scale_ref[...].astype(x_ref.dtype)   # bf16 stays bf16: no f32 round trip
    o_ref[...] = x_ref[...] * s


_LANE_CANDIDATES = (4096, 2048, 1024, 512, 256, 128)
_TILE_BYTE_BUDGET = 2 << 20   # ~2 MiB per tile -> ~8 MiB resident with double buffering


def _choose_lane_width(x) -> int:
    """Largest multiple of 128 that exactly tiles one sample's elements (lane-dense)."""
    elems = int(math.prod(x.shape[1:])) if x.ndim > 1 else 1
    for cand in _LANE_CANDIDATES:
        if elems % cand == 0:
            return cand
    # TODO(synk): pad up to a multiple of 128 in the wrapper for fully lane-dense stores;
    # for now fall back to the original trailing dim (correct; masked vst if C % 128 != 0).
    return x.shape[-1] if x.ndim > 1 else 1


def drop_path(x, drop_prob: float, training: bool, key=None):
    """Pallas TPU DropPath; matches torch `drop_path(x, drop_prob, training)`."""
    if drop_prob == 0.0 or not training:
        return x  # identity path, same as the PyTorch module

    assert key is not None, "training-mode DropPath needs a PRNG key"
    keep_prob = 1.0 - drop_prob

    B = x.shape[0]
    elems = int(math.prod(x.shape[1:])) if x.ndim > 1 else 1

    # One {0, 1/keep_prob} scalar per batch sample (divide folded in once; B scalars total).
    u = jax.random.uniform(key, (B,), dtype=jnp.float32)
    scale = jnp.floor(keep_prob + u) / keep_prob

    # Flat lane-dense view: (B, elems) -> (R, L) rows that span batch samples.
    L = _choose_lane_width(x)
    S = max(elems // L, 1)
    R = B * S
    x2 = x.reshape(R, L)
    scale_rows = jnp.repeat(scale, S).reshape(R, 1)   # tiny: < 2% extra HBM traffic

    # Byte-budgeted row block, aligned to the dtype's sublane packing.
    itemsize = jnp.dtype(x.dtype).itemsize
    pack = {4: 8, 2: 16, 1: 32}.get(itemsize, 8)
    rows_budget = max(pack, (_TILE_BYTE_BUDGET // (L * itemsize)) // pack * pack)
    row_block = min(R, rows_budget)
    grid = (pl.cdiv(R, row_block),)   # ragged last block handled by Pallas (writes dropped)

    tile_bytes = row_block * L * itemsize
    # 2 in + 2 out pipelined buffers (+ tiny scale buffers) with headroom; safe on v5e/v6e/v7x.
    vmem_limit = int(min(max(6 * tile_bytes + (1 << 20), 16 << 20), 32 << 20))

    out2 = pl.pallas_call(
        _drop_path_kernel,
        out_shape=jax.ShapeDtypeStruct((R, L), x.dtype),
        grid=grid,
        in_specs=[
            pl.BlockSpec((row_block, 1), lambda r: (r, 0)),   # per-row scale
            pl.BlockSpec((row_block, L), lambda r: (r, 0)),   # data tile
        ],
        out_specs=pl.BlockSpec((row_block, L), lambda r: (r, 0)),
        compiler_params=pltpu.CompilerParams(
            dimension_semantics=("parallel",),
            vmem_limit_bytes=vmem_limit,
        ),
    )(scale_rows, x2)
    return out2.reshape(x.shape)


def drop_path_ref(x, drop_prob: float, training: bool, key=None):
    """Pure-JAX reference mirroring the PyTorch forward, using the same uniform draw."""
    if drop_prob == 0.0 or not training:
        return x
    keep_prob = 1.0 - drop_prob
    u = jax.random.uniform(key, (x.shape[0],), dtype=jnp.float32)
    mask_shape = (x.shape[0],) + (1,) * (x.ndim - 1)
    random_tensor = jnp.floor(keep_prob + u).reshape(mask_shape).astype(x.dtype)
    return (x / keep_prob * random_tensor).astype(x.dtype)


if __name__ == "__main__":
    key = jax.random.PRNGKey(0)
    kx, kmask, kx2, kx3 = jax.random.split(key, 4)
    drop_prob = 0.25

    # (B, N, C) token-shaped input, as DropPath is used around the MAE transformer blocks.
    B, N, C = 2, 8, 32
    x = jax.random.normal(kx, (B, N, C), jnp.float32)
    out = jax.block_until_ready(drop_path(x, drop_prob, training=True, key=kmask))
    ref = drop_path_ref(x, drop_prob, training=True, key=kmask)
    assert out.shape == x.shape
    assert jnp.allclose(out, ref, atol=1e-5, rtol=1e-5), "f32 token input mismatch"

    # 4-D feature-map-shaped input (lane-dense re-view across the spatial dims).
    x4 = jax.random.normal(kx2, (2, 4, 16, 16), jnp.float32)
    out4 = jax.block_until_ready(drop_path(x4, drop_prob, training=True, key=kmask))
    ref4 = drop_path_ref(x4, drop_prob, training=True, key=kmask)
    assert jnp.allclose(out4, ref4, atol=1e-5, rtol=1e-5), "f32 4-D input mismatch"

    # Per-sample element count not divisible by 128 -> fallback (possibly masked-store) path.
    x5 = jax.random.normal(kx3, (2, 5, 96), jnp.float32)
    out5 = jax.block_until_ready(drop_path(x5, drop_prob, training=True, key=kmask))
    ref5 = drop_path_ref(x5, drop_prob, training=True, key=kmask)
    assert jnp.allclose(out5, ref5, atol=1e-5, rtol=1e-5), "fallback path mismatch"

    # bf16 path: multiply stays in bf16 (no f32 round trip) -> looser tolerance.
    xb = x.astype(jnp.bfloat16)
    outb = jax.block_until_ready(drop_path(xb, drop_prob, training=True, key=kmask))
    refb = drop_path_ref(xb, drop_prob, training=True, key=kmask)
    assert jnp.allclose(outb.astype(jnp.float32), refb.astype(jnp.float32),
                        atol=2e-2, rtol=2e-2), "bf16 mismatch"

    # Eval mode and drop_prob == 0 are identity, exactly like the PyTorch module.
    assert jnp.array_equal(drop_path(x, drop_prob, training=False), x)
    assert jnp.array_equal(drop_path(x, 0.0, training=True, key=kmask), x)

    print("KERNEL_OK")
</pallas_src>

<mosaic_0001>
module attributes {stable_mosaic.version = 11 : i64} {
  func.func @_drop_path_kernel(%arg0: i32, %arg1: memref<2x1xf32, #tpu.memory_space<vmem>>, %arg2: memref<2x256xf32, #tpu.memory_space<vmem>>, %arg3: memref<2x256xf32, #tpu.memory_space<vmem>>) attributes {dimension_semantics = [#tpu.dimension_semantics<parallel>], iteration_bounds = array<i64: 1>, scalar_prefetch = 0 : i64, scratch_operands = 0 : i64, tpu.core_type = #tpu.core_type<tc>, window_params = [{transform_indices = @transform_0, window_bounds = array<i64: 2, 1>}, {transform_indices = @transform_1, window_bounds = array<i64: 2, 256>}, {transform_indices = @transform_2, window_bounds = array<i64: 2, 256>}]} {
    %c0 = arith.constant 0 : index
    %c0_0 = arith.constant 0 : index
    %0 = vector.load %arg1[%c0, %c0_0] : memref<2x1xf32, #tpu.memory_space<vmem>>, vector<2x1xf32>
    %c0_1 = arith.constant 0 : index
    %c0_2 = arith.constant 0 : index
    %1 = vector.load %arg2[%c0_1, %c0_2] : memref<2x256xf32, #tpu.memory_space<vmem>>, vector<2x256xf32>
    %2 = vector.broadcast %0 : vector<2x1xf32> to vector<2x256xf32>
    %3 = arith.mulf %1, %2 : vector<2x256xf32>
    %c0_3 = arith.constant 0 : index
    %c0_4 = arith.constant 0 : index
    %4 = vector.load %arg3[%c0_3, %c0_4] : memref<2x256xf32, #tpu.memory_space<vmem>>, vector<2x256xf32>
    tpu.vector_store %arg3[%c0_3, %c0_4], %3 {strides = array<i32>} : memref<2x256xf32, #tpu.memory_space<vmem>>, vector<2x256xf32>,
    return
  }
  func.func @transform_0(%arg0: i32) -> (i32, i32) {
    %c0_i32 = arith.constant 0 : i32
    %c0_i32_0 = arith.constant 0 : i32
    return %arg0, %c0_i32 : i32, i32
  }
  func.func @transform_1(%arg0: i32) -> (i32, i32) {
    %c0_i32 = arith.constant 0 : i32
    %c0_i32_0 = arith.constant 0 : i32
    return %arg0, %c0_i32 : i32, i32
  }
  func.func @transform_2(%arg0: i32) -> (i32, i32) {
    %c0_i32 = arith.constant 0 : i32
    %c0_i32_0 = arith.constant 0 : i32
    return %arg0, %c0_i32 : i32, i32
  }
}

</mosaic_0001>

<bundles_post_ra>
// kernel: tpu_custom_call.1
= control target key start
LH: loop header
LB: loop body
LE: loop exit
PB: predicated region body
PF: predicated region fallthrough
CT: control target
= control target key end

     0   :  { %v70_v1 = vmov 0   ;;  %s106_s0 = inlined_call_operand.vmem [shape: f32[2,1], index: 0, kind: input, shape index: {}]   ;;  %s107_s1 = inlined_call_operand.vmem [shape: f32[2,256], index: 1, kind: input, shape index: {}]   ;;  %s108_s2 = inlined_call_operand.hbm [shape: f32[2,256], index: 2, kind: output, shape index: {}]  }
   0x1   :  { %v12_v0 = vld [vmem:[%s106_s0] sm:$0x3]  ;;  %45 = vset.pattern.permute.xlu0 %v70_v1 }
   0x2   :  { %7 = vsyncpa [#allocation3], 0  ;;  %16 = vperm.xlu0 %45, %v12_v0   ;;  %v71_v2 = vmov 269488144   ;;  %v21_v4 = vlaneseq  ;;  %v13_v9 = vld [vmem:[%s107_s1] sm:$0xf] }
   0x3   :  { %v19_v3 = vunpack.c.l.s4 %v71_v2  ;;  %s72_s13 = smov [#allocation2]  }
   0x4   :  { %v22_v6 = vshrl.u32 %v21_v4, 7  ;;  %s34_s14 = sshll.u32 %s72_s13, 4  ;;  %s35_s14 = int_to_ptr.vmem [resolvable:$true] %s34_s14 }
   0x5   :  { %v20_v5 = vunpack.c.0.s8 %v19_v3  ;;  %s46_s0 = scalar_lea.vmem %s35_s14, 64  ;;  %p51_p1 = scmp.lt.s32.totalorder %s35_s14, %s35_s14 }
   0x6   :  { %p47_p0 = scmp.ne.s32.totalorder %s35_s14, %s46_s0  ;;  %p52_p2 = scmp.lt.s32.totalorder %s46_s0, %s46_s0 }
   0x7   :  { %v23_v7 = vsub.s32 %v20_v5, %v22_v6 }
   0x8   :  { %p53_p3 = por %p52_p2, %p51_p1 }
   0xa   :  { %p54_p4 = pnand %p53_p3, %p47_p0 }
  0x81   :  { %v17_v8 = vpop.permute.xlu0 %16 }
  0x82   :  { %v24_v10 = vrot.slane %v17_v8, %v23_v7 }
  0x84   :  { %v26_v11 = vmul.f32 %v24_v10, %v13_v9 }
  0x86   :  { %27 = vst [vmem:[#allocation2] sm:$0xf] %v26_v11 }
  0x87   :  { %57 = shalt.err (!%p54_p4)
}
  0x88   :  { %s58_s17 = scalar_lea.hbm %s108_s2, 64 }
  0x89   :  { %p59_p5 = scmp.ne.s32.totalorder %s108_s2, %s58_s17  ;;  %p62_p6 = scmp.lt.u32.totalorder %s58_s17, %s108_s2 }
  0x8b   :  { %p64_p7 = pnand %p62_p6, %p59_p5 }
  0x8d   :  { %67 = shalt.err (!%p64_p7)
}
  0x8e   :  { %37 = dma.vmem_to_hbm [thread:$0]  %s35_s14, 64, %s108_s2, [#allocation3]  }
  0x8f   :  { %68 = dma.done.wait [#allocation3], 64  }
  0x90   :  { %69 = vsyncadd [#allocation3], 4294967232 }
  0x91   :  { %41 = vsyncpa [#allocation3], 1 }

</bundles_post_ra>
